<compile_context>
chip_gen: v7x
topology: tpu7x:2x2x1
jax: 0.10.0
libtpu: 0.0.40
codegen_flags: <defaults>
</compile_context>

<pallas_src>
import jax
import jax.numpy as jnp
from jax.experimental import pallas as pl
from jax.experimental.pallas import tpu as pltpu


def _round_up(v: int, m: int) -> int:
    return (v + m - 1) // m * m


def _cdiv(a: int, b: int) -> int:
    return (a + b - 1) // b


def _leaky_relu(v):
    # Equivalent to where(v > 0, v, 0.2*v) for slope 0.2 < 1; one VPU op fewer.
    return jnp.maximum(v, 0.2 * v)


# -----------------------------------------------------------------------------
# Kernel: one (block_batch, Hp) x-tile, one tk-wide hidden slice per k-step.
# -----------------------------------------------------------------------------
def mlp_resblock_kernel(x_ref, w1_ref, b1_ref, w2_ref, b2_ref, o_ref, acc_ref):
    k = pl.program_id(1)

    @pl.when(k == 0)
    def _():
        acc_ref[...] = jnp.zeros_like(acc_ref)

    # fc1 for this hidden slice: (bb, Hp) @ (Hp, tk) -> (bb, tk), f32 accum.
    lhs = x_ref[...]
    if lhs.dtype != w1_ref.dtype:            # explicit MXU precision path
        lhs = lhs.astype(w1_ref.dtype)
    h = jnp.dot(lhs, w1_ref[...], preferred_element_type=jnp.float32)
    h = _leaky_relu(h + b1_ref[...].astype(jnp.float32))

    # fc2 partial: (bb, tk) @ (tk, Hp) accumulated into f32 scratch.
    acc_ref[...] += jnp.dot(h.astype(w2_ref.dtype), w2_ref[...],
                            preferred_element_type=jnp.float32)

    @pl.when(k == pl.num_programs(1) - 1)
    def _():
        out = (acc_ref[...]
               + b2_ref[...].astype(jnp.float32)
               + x_ref[...].astype(jnp.float32))          # residual
        o_ref[...] = _leaky_relu(out).astype(o_ref.dtype)


# -----------------------------------------------------------------------------
# Parameter preparation (done once, not per forward call).
# -----------------------------------------------------------------------------
def prepare_params(w1, b1, w2, b2, *, param_dtype=None):
    """Pad parameters once to a lane-dense hidden dim (multiple of 128).

    w1, w2 are stored as (in, out), i.e. the transpose of the PyTorch weight,
    so the kernel computes x @ w + b.  Zero padding is exact for this block
    (zero weight rows/cols, zero bias, zero residual columns).
    Optionally cast to param_dtype (e.g. jnp.bfloat16) for MXU throughput.
    """
    H = w1.shape[0]
    Hp = _round_up(H, 128)
    b1 = jnp.reshape(b1, (1, -1))
    b2 = jnp.reshape(b2, (1, -1))
    pad_h = Hp - H
    if pad_h:
        w1 = jnp.pad(w1, ((0, pad_h), (0, pad_h)))
        w2 = jnp.pad(w2, ((0, pad_h), (0, pad_h)))
        b1 = jnp.pad(b1, ((0, 0), (0, pad_h)))
        b2 = jnp.pad(b2, ((0, 0), (0, pad_h)))
    if param_dtype is not None:
        w1, b1, w2, b2 = (a.astype(param_dtype) for a in (w1, b1, w2, b2))
    return dict(w1=w1, b1=b1, w2=w2, b2=b2, hidden=H)


# -----------------------------------------------------------------------------
# Tiling / VMEM-budget selection.
# -----------------------------------------------------------------------------
def _vmem_capacity_bytes() -> int:
    try:
        info = pltpu.get_tpu_info()
        cap = getattr(info, "vmem_capacity_bytes", None)
        if cap:
            return int(cap)
    except Exception:
        pass
    return 64 * 1024 * 1024   # conservative fallback (v7x per-core size)


def _tk_candidates(Hp: int):
    """Multiples of 128 that exactly divide Hp, largest first."""
    m = Hp // 128
    return sorted({128 * d for d in range(1, m + 1) if m % d == 0}, reverse=True)


def _select_tiling(B, Hp, x_itemsize, w_itemsize, sub, budget):
    """Pick (block_batch, tk, need_bytes) so tiles + weight blocks fit VMEM."""
    limit = int(0.9 * budget)
    small_vmem = budget < 96 * 1024 * 1024            # v7x-class VMEM
    cap_rows = 256 if (Hp >= 2048 and small_vmem) else 512

    # >= 4 batch steps when the batch allows it (pipelining per core), tiles
    # sized as cdiv(B, n_steps) rounded to the sublane so tail padding < tile.
    min_steps = min(4, max(1, B // sub))
    n_steps = max(_cdiv(B, cap_rows), min_steps, 1)
    bb = max(sub, _round_up(_cdiv(B, n_steps), sub))

    cands = _tk_candidates(Hp)

    def weight_bytes(tk):
        # double-buffered w1 (Hp,tk) + w2 (tk,Hp) + bias slices
        return 4 * Hp * tk * w_itemsize + 2 * (tk + Hp) * w_itemsize

    while True:
        # double-buffered x/out tiles + f32 accumulator scratch
        # + ~4 (bb,Hp)-sized f32 temporaries (h, h-cast, out, x-cast).
        fixed = (2 * 2 * bb * Hp * x_itemsize
                 + bb * Hp * 4
                 + 4 * bb * Hp * 4)
        tk = next((t for t in cands if fixed + weight_bytes(t) <= limit), 128)
        need = fixed + weight_bytes(tk)
        if need <= limit or bb <= sub:
            return bb, tk, need
        bb = max(sub, _round_up(bb // 2, sub))        # shrink the batch tile


# -----------------------------------------------------------------------------
# Forward wrapper.
# -----------------------------------------------------------------------------
def mlp_residual_block(x, params, *, block_batch=None, block_k=None):
    """x: (B, H).  params: output of prepare_params()."""
    B, H = x.shape
    assert H == params["hidden"], "hidden size mismatch with prepared params"
    w1, b1, w2, b2 = params["w1"], params["b1"], params["w2"], params["b2"]
    Hp = w1.shape[0]

    x_itemsize = jnp.dtype(x.dtype).itemsize
    w_itemsize = jnp.dtype(w1.dtype).itemsize
    sub = 16 if x.dtype == jnp.bfloat16 else 8

    budget = int(_vmem_capacity_bytes() * 0.85)       # leave Mosaic headroom
    bb, tk, need = _select_tiling(B, Hp, x_itemsize, w_itemsize, sub, budget)
    if block_batch is not None:
        bb = max(sub, _round_up(block_batch, sub))
    if block_k is not None:
        tk = min(Hp, max(128, _round_up(block_k, 128)))
        assert Hp % tk == 0, "block_k must divide the padded hidden dim"

    Bp = _round_up(B, bb)
    grid_b = Bp // bb
    grid_k = Hp // tk

    # Per-call padding of x only (weights were padded once in prepare_params).
    pad_b, pad_h = Bp - B, Hp - H
    x_p = jnp.pad(x, ((0, pad_b), (0, pad_h))) if (pad_b or pad_h) else x

    vmem_limit = min(budget,
                     max(_round_up(int(need * 1.25), 1 << 20), 32 * 1024 * 1024))

    weight_reads = (2 * Hp * Hp + 2 * Hp) * w_itemsize
    if grid_k > 1:
        weight_reads *= grid_b   # weight blocks re-streamed per batch tile
    cost = pl.CostEstimate(
        flops=4 * Bp * Hp * Hp,                        # two (Bp,Hp)x(Hp,Hp) matmuls
        transcendentals=0,
        bytes_accessed=2 * Bp * Hp * x_itemsize + weight_reads,  # x read + out write
    )

    out_p = pl.pallas_call(
        mlp_resblock_kernel,
        out_shape=jax.ShapeDtypeStruct((Bp, Hp), x.dtype),
        grid_spec=pltpu.PrefetchScalarGridSpec(
            num_scalar_prefetch=0,
            grid=(grid_b, grid_k),
            in_specs=[
                pl.BlockSpec((bb, Hp), lambda i, k: (i, 0)),   # x (resident over k)
                pl.BlockSpec((Hp, tk), lambda i, k: (0, k)),   # w1 column block
                pl.BlockSpec((1, tk), lambda i, k: (0, k)),    # b1 slice
                pl.BlockSpec((tk, Hp), lambda i, k: (k, 0)),   # w2 row block
                pl.BlockSpec((1, Hp), lambda i, k: (0, 0)),    # b2
            ],
            out_specs=pl.BlockSpec((bb, Hp), lambda i, k: (i, 0)),
            scratch_shapes=[pltpu.VMEM((bb, Hp), jnp.float32)],
        ),
        compiler_params=pltpu.CompilerParams(
            dimension_semantics=("parallel", "arbitrary"),
            vmem_limit_bytes=vmem_limit,
        ),
        cost_estimate=cost,
    )(x_p, w1, b1, w2, b2)

    if pad_b or pad_h:
        out_p = out_p[:B, :H]
    return out_p


# -----------------------------------------------------------------------------
# Pure-JAX reference matching the PyTorch forward exactly.
# -----------------------------------------------------------------------------
def reference(x, w1, b1, w2, b2):
    def lrelu(v):
        return jnp.where(v > 0, v, 0.2 * v)
    h = lrelu(x @ w1 + b1)
    return lrelu(h @ w2 + b2 + x)


if __name__ == "__main__":
    batch, hidden = 8, 32

    key = jax.random.PRNGKey(0)
    kx, kw1, kb1, kw2, kb2 = jax.random.split(key, 5)

    # Synthetic parameters (PyTorch Linear keeps W as (out, in); here we store
    # the transpose (in, out) so the kernel computes x @ W^T + b).
    bound = 1.0 / jnp.sqrt(hidden)
    w1 = jax.random.uniform(kw1, (hidden, hidden), jnp.float32, -bound, bound)
    b1 = jax.random.uniform(kb1, (hidden,), jnp.float32, -bound, bound)
    w2 = jax.random.uniform(kw2, (hidden, hidden), jnp.float32, -bound, bound)
    b2 = jax.random.uniform(kb2, (hidden,), jnp.float32, -bound, bound)

    x = jax.random.normal(kx, (batch, hidden), jnp.float32)

    params = prepare_params(w1, b1, w2, b2)   # pad once, outside the call path
    out = jax.block_until_ready(mlp_residual_block(x, params))
    ref = reference(x, w1, b1, w2, b2)

    assert out.shape == (batch, hidden)
    assert jnp.allclose(out, ref, atol=1e-5, rtol=1e-5), "mismatch vs reference"

    print("KERNEL_OK")
</pallas_src>

<mosaic_0001>
module attributes {stable_mosaic.version = 11 : i64} {
  func.func @mlp_resblock_kernel(%arg0: i32, %arg1: i32, %arg2: memref<8x128xf32, #tpu.memory_space<vmem>>, %arg3: memref<128x128xf32, #tpu.memory_space<vmem>>, %arg4: memref<1x128xf32, #tpu.memory_space<vmem>>, %arg5: memref<128x128xf32, #tpu.memory_space<vmem>>, %arg6: memref<1x128xf32, #tpu.memory_space<vmem>>, %arg7: memref<8x128xf32, #tpu.memory_space<vmem>>, %arg8: memref<8x128xf32, #tpu.memory_space<vmem>>) attributes {dimension_semantics = [#tpu.dimension_semantics<parallel>, #tpu.dimension_semantics<arbitrary>], iteration_bounds = array<i64: 1, 1>, scalar_prefetch = 0 : i64, scratch_operands = 1 : i64, tpu.core_type = #tpu.core_type<tc>, window_params = [{transform_indices = @transform_0, window_bounds = array<i64: 8, 128>}, {transform_indices = @transform_1, window_bounds = array<i64: 128, 128>}, {transform_indices = @transform_2, window_bounds = array<i64: 1, 128>}, {transform_indices = @transform_3, window_bounds = array<i64: 128, 128>}, {pipeline_mode = #tpu.pipeline_mode<synchronous>, transform_indices = @transform_4, window_bounds = array<i64: 1, 128>}, {transform_indices = @transform_5, window_bounds = array<i64: 8, 128>}]} {
    %c0_i32 = arith.constant 0 : i32
    %0 = arith.cmpi eq, %arg1, %c0_i32 : i32
    %1 = arith.extui %0 : i1 to i32
    %c0_i32_0 = arith.constant 0 : i32
    %2 = arith.cmpi ne, %1, %c0_i32_0 : i32
    scf.if %2 {
      %cst_16 = arith.constant 0.000000e+00 : f32
      %20 = vector.broadcast %cst_16 : f32 to vector<8x128xf32>
      %c0_17 = arith.constant 0 : index
      %c0_18 = arith.constant 0 : index
      %21 = vector.load %arg8[%c0_17, %c0_18] : memref<8x128xf32, #tpu.memory_space<vmem>>, vector<8x128xf32>
      tpu.vector_store %arg8[%c0_17, %c0_18], %20 {strides = array<i32>} : memref<8x128xf32, #tpu.memory_space<vmem>>, vector<8x128xf32>,
    } else {
    }
    %c0 = arith.constant 0 : index
    %c0_1 = arith.constant 0 : index
    %3 = vector.load %arg2[%c0, %c0_1] : memref<8x128xf32, #tpu.memory_space<vmem>>, vector<8x128xf32>
    %c0_2 = arith.constant 0 : index
    %c0_3 = arith.constant 0 : index
    %4 = vector.load %arg3[%c0_2, %c0_3] : memref<128x128xf32, #tpu.memory_space<vmem>>, vector<128x128xf32>
    %cst = arith.constant dense<0.000000e+00> : vector<8x128xf32>
    %5 = tpu.matmul %3, %4, %cst {dimension_numbers = #tpu.dot_dimension_numbers<[1], [0], [0], [1], [0, 0, 1, 1], [], []>} : vector<8x128xf32>, vector<128x128xf32>, vector<8x128xf32> -> vector<8x128xf32>
    %c0_4 = arith.constant 0 : index
    %c0_5 = arith.constant 0 : index
    %6 = vector.load %arg4[%c0_4, %c0_5] : memref<1x128xf32, #tpu.memory_space<vmem>>, vector<1x128xf32>
    %7 = vector.broadcast %6 : vector<1x128xf32> to vector<8x128xf32>
    %8 = arith.addf %5, %7 : vector<8x128xf32>
    %cst_6 = arith.constant 2.000000e-01 : f32
    %9 = vector.broadcast %cst_6 : f32 to vector<8x128xf32>
    %10 = arith.mulf %9, %8 : vector<8x128xf32>
    %11 = arith.maximumf %8, %10 : vector<8x128xf32>
    %c0_7 = arith.constant 0 : index
    %c0_8 = arith.constant 0 : index
    %12 = vector.load %arg8[%c0_7, %c0_8] : memref<8x128xf32, #tpu.memory_space<vmem>>, vector<8x128xf32>
    %c0_9 = arith.constant 0 : index
    %c0_10 = arith.constant 0 : index
    %13 = vector.load %arg5[%c0_9, %c0_10] : memref<128x128xf32, #tpu.memory_space<vmem>>, vector<128x128xf32>
    %cst_11 = arith.constant dense<0.000000e+00> : vector<8x128xf32>
    %14 = tpu.matmul %11, %13, %cst_11 {dimension_numbers = #tpu.dot_dimension_numbers<[1], [0], [0], [1], [0, 0, 1, 1], [], []>} : vector<8x128xf32>, vector<128x128xf32>, vector<8x128xf32> -> vector<8x128xf32>
    %15 = arith.addf %12, %14 : vector<8x128xf32>
    %c0_12 = arith.constant 0 : index
    %c0_13 = arith.constant 0 : index
    %16 = vector.load %arg8[%c0_12, %c0_13] : memref<8x128xf32, #tpu.memory_space<vmem>>, vector<8x128xf32>
    tpu.vector_store %arg8[%c0_12, %c0_13], %15 {strides = array<i32>} : memref<8x128xf32, #tpu.memory_space<vmem>>, vector<8x128xf32>,
    %c0_i32_14 = arith.constant 0 : i32
    %17 = arith.cmpi eq, %arg1, %c0_i32_14 : i32
    %18 = arith.extui %17 : i1 to i32
    %c0_i32_15 = arith.constant 0 : i32
    %19 = arith.cmpi ne, %18, %c0_i32_15 : i32
    scf.if %19 {
      %c0_16 = arith.constant 0 : index
      %c0_17 = arith.constant 0 : index
      %20 = vector.load %arg8[%c0_16, %c0_17] : memref<8x128xf32, #tpu.memory_space<vmem>>, vector<8x128xf32>
      %c0_18 = arith.constant 0 : index
      %c0_19 = arith.constant 0 : index
      %21 = vector.load %arg6[%c0_18, %c0_19] : memref<1x128xf32, #tpu.memory_space<vmem>>, vector<1x128xf32>
      %22 = vector.broadcast %21 : vector<1x128xf32> to vector<8x128xf32>
      %23 = arith.addf %20, %22 : vector<8x128xf32>
      %c0_20 = arith.constant 0 : index
      %c0_21 = arith.constant 0 : index
      %24 = vector.load %arg2[%c0_20, %c0_21] : memref<8x128xf32, #tpu.memory_space<vmem>>, vector<8x128xf32>
      %25 = arith.addf %23, %24 : vector<8x128xf32>
      %cst_22 = arith.constant 2.000000e-01 : f32
      %26 = vector.broadcast %cst_22 : f32 to vector<8x128xf32>
      %27 = arith.mulf %26, %25 : vector<8x128xf32>
      %28 = arith.maximumf %25, %27 : vector<8x128xf32>
      %c0_23 = arith.constant 0 : index
      %c0_24 = arith.constant 0 : index
      %29 = vector.load %arg7[%c0_23, %c0_24] : memref<8x128xf32, #tpu.memory_space<vmem>>, vector<8x128xf32>
      tpu.vector_store %arg7[%c0_23, %c0_24], %28 {strides = array<i32>} : memref<8x128xf32, #tpu.memory_space<vmem>>, vector<8x128xf32>,
    } else {
    }
    return
  }
  func.func @transform_0(%arg0: i32, %arg1: i32) -> (i32, i32) {
    %c0_i32 = arith.constant 0 : i32
    %c0_i32_0 = arith.constant 0 : i32
    return %arg0, %c0_i32 : i32, i32
  }
  func.func @transform_1(%arg0: i32, %arg1: i32) -> (i32, i32) {
    %c0_i32 = arith.constant 0 : i32
    %c0_i32_0 = arith.constant 0 : i32
    return %c0_i32, %arg1 : i32, i32
  }
  func.func @transform_2(%arg0: i32, %arg1: i32) -> (i32, i32) {
    %c0_i32 = arith.constant 0 : i32
    %c0_i32_0 = arith.constant 0 : i32
    return %c0_i32, %arg1 : i32, i32
  }
  func.func @transform_3(%arg0: i32, %arg1: i32) -> (i32, i32) {
    %c0_i32 = arith.constant 0 : i32
    %c0_i32_0 = arith.constant 0 : i32
    return %arg1, %c0_i32 : i32, i32
  }
  func.func @transform_4(%arg0: i32, %arg1: i32) -> (i32, i32) {
    %c0_i32 = arith.constant 0 : i32
    %c0_i32_0 = arith.constant 0 : i32
    %c0_i32_1 = arith.constant 0 : i32
    return %c0_i32, %c0_i32_0 : i32, i32
  }
  func.func @transform_5(%arg0: i32, %arg1: i32) -> (i32, i32) {
    %c0_i32 = arith.constant 0 : i32
    %c0_i32_0 = arith.constant 0 : i32
    return %arg0, %c0_i32 : i32, i32
  }
}

</mosaic_0001>

<bundles_post_ra>
// kernel: tpu_custom_call.1
= control target key start
LH: loop header
LB: loop body
LE: loop exit
PB: predicated region body
PF: predicated region fallthrough
CT: control target
= control target key end

     0   :  { %10 = vsyncpa [#allocation4], 0  ;;  %s655_s0 = inlined_call_operand.hbm [shape: f32[8,128], index: 0, kind: input, shape index: {}]   ;;  %s656_s1 = inlined_call_operand.hbm [shape: f32[128,128], index: 1, kind: input, shape index: {}]   ;;  %s657_s2 = inlined_call_operand.vmem [shape: f32[1,128], index: 2, kind: input, shape index: {}]   ;;  %s658_s3 = inlined_call_operand.hbm [shape: f32[128,128], index: 3, kind: input, shape index: {}]   ;;  %s659_s4 = inlined_call_operand.vmem [shape: f32[1,128], index: 4, kind: input, shape index: {}]   ;;  %s660_s5 = inlined_call_operand.hbm [shape: f32[8,128], index: 5, kind: output, shape index: {}]  }
   0x1   :  { %11 = vsyncpa [#allocation7], 0 }
   0x2   :  { %12 = vsyncpa [#allocation5], 0  ;;  %s540_s18 = smov [#allocation6]   ;;  %s446_s22 = scalar_lea.hbm %s656_s1, 2048 }
   0x3   :  { %s28_s19 = sshll.u32 %s540_s18, 4  ;;  %p447_p0 = scmp.ne.s32.totalorder %s656_s1, %s446_s22  ;;  %s29_s19 = int_to_ptr.vmem [resolvable:$true] %s28_s19 }
   0x4   :  { %p450_p1 = scmp.lt.u32.totalorder %s446_s22, %s656_s1 }
   0x6   :  { %p452_p2 = pnand %p450_p1, %p447_p0 }
   0x8   :  { %455 = shalt.err (!%p452_p2)
}
   0x9   :  { %s456_s27 = scalar_lea.vmem %s29_s19, 2048  ;;  %p461_p4 = scmp.lt.s32.totalorder %s29_s19, %s29_s19 }
   0xa   :  { %p457_p3 = scmp.ne.s32.totalorder %s29_s19, %s456_s27  ;;  %p462_p5 = scmp.lt.s32.totalorder %s456_s27, %s456_s27 }
   0xc   :  { %p463_p6 = por %p462_p5, %p461_p4 }
   0xe   :  { %p464_p7 = pnand %p463_p6, %p457_p3 }
  0x10   :  { %467 = shalt.err (!%p464_p7)
}
  0x11   :  { %s541_s28 = smov 128   ;;  %s542_s29 = smov 8  }
  0x12   :  { %34 = dma.hbm_to_vmem [thread:$0]  %s656_s1, 2048, %s29_s19, [#allocation7], %s541_s28, %s541_s28, %s542_s29  }
  0x13   :  { %s543_s7 = smov [#allocation3]   ;;  %s544_s9 = smov [#allocation8]  }
  0x14   :  { %s19_s8 = sshll.u32 %s543_s7, 4  ;;  %s42_s10 = sshll.u32 %s544_s9, 4  ;;  %s20_s8 = int_to_ptr.vmem [resolvable:$true] %s19_s8  ;;  %s43_s10 = int_to_ptr.vmem [resolvable:$true] %s42_s10 }
  0x15   :  { %s468_s13 = scalar_lea.hbm %s655_s0, 128 }
  0x16   :  { %p469_p8 = scmp.ne.s32.totalorder %s655_s0, %s468_s13  ;;  %p472_p9 = scmp.lt.u32.totalorder %s468_s13, %s655_s0 }
  0x18   :  { %p474_p10 = pnand %p472_p9, %p469_p8 }
  0x1a   :  { %477 = shalt.err (!%p474_p10)
}
  0x1b   :  { %s478_s1 = scalar_lea.vmem %s20_s8, 128  ;;  %p483_p12 = scmp.lt.s32.totalorder %s20_s8, %s20_s8 }
  0x1c   :  { %p479_p11 = scmp.ne.s32.totalorder %s20_s8, %s478_s1  ;;  %p484_p13 = scmp.lt.s32.totalorder %s478_s1, %s478_s1 }
  0x1e   :  { %p485_p0 = por %p484_p13, %p483_p12 }
  0x20   :  { %p486_p1 = pnand %p485_p0, %p479_p11 }
  0x22   :  { %489 = shalt.err (!%p486_p1)
}
  0x23   :  { %22 = dma.hbm_to_vmem [thread:$0]  %s655_s0, 128, %s20_s8, [#allocation4]  }
  0x24   :  { %s490_s22 = scalar_lea.hbm %s658_s3, 2048 }
  0x25   :  { %p491_p2 = scmp.ne.s32.totalorder %s658_s3, %s490_s22  ;;  %p494_p3 = scmp.lt.u32.totalorder %s490_s22, %s658_s3 }
  0x27   :  { %p496_p4 = pnand %p494_p3, %p491_p2 }
  0x29   :  { %499 = shalt.err (!%p496_p4)
}
  0x2a   :  { %s500_s27 = scalar_lea.vmem %s43_s10, 2048  ;;  %p505_p6 = scmp.lt.s32.totalorder %s43_s10, %s43_s10 }
  0x2b   :  { %p501_p5 = scmp.ne.s32.totalorder %s43_s10, %s500_s27  ;;  %p506_p7 = scmp.lt.s32.totalorder %s500_s27, %s500_s27 }
  0x2d   :  { %p507_p8 = por %p506_p7, %p505_p6 }
  0x2f   :  { %p508_p9 = pnand %p507_p8, %p501_p5 }
  0x31   :  { %511 = shalt.err (!%p508_p9)
}
  0x32   :  { %48 = dma.hbm_to_vmem [thread:$0]  %s658_s3, 2048, %s43_s10, [#allocation7], %s541_s28, %s541_s28, %s542_s29  }
  0x33   :  { %534 = dma.done.wait [#allocation4], 128  }
  0x34   :  { %535 = vsyncadd [#allocation4], 4294967168 }
  0x35   :  { %536 = dma.done.wait [#allocation7], 4096  }
  0x36   :  { %537 = vsyncadd [#allocation7], 4294963200  ;;  %v545_v0 = vmov 0.0|0.0   ;;  %vm546_vm0 = vmmov 0   ;;  %v547_v1 = vmov 0.0   ;;  %v66_v2 = vld [vmem:[#allocation6] sm:$0xff] }
  0x37   :  { %389 = vmatprep.subr.bf16.mxu0 %v545_v0  ;;  %351 = vmatprep.mubr.msk.f32.mxu0 %vm546_vm0, %v547_v1  ;;  %v67_v3 = vld [vmem:[#allocation6 + $0x8] sm:$0xff]  ;;  %v68_v4 = vld [vmem:[#allocation6 + $0x10] sm:$0xff]  ;;  %v69_v6 = vld [vmem:[#allocation6 + $0x18] sm:$0xff]  ;;  %s548_s7 = smov [#allocation9]  }
  0x38   :  { %413 = vmatprep.subr.bf16.mxu1 %v545_v0  ;;  %386 = vmatprep.mubr.msk.f32.mxu1 %vm546_vm0, %v547_v1  ;;  %v390_v5 = vpack.c.bf16 %v67_v3, %v66_v2  ;;  %v393_v7 = vpack.c.bf16 %v69_v6, %v68_v4  ;;  %v70_v8 = vld [vmem:[#allocation6 + $0x20] sm:$0xff]  ;;  %v71_v9 = vld [vmem:[#allocation6 + $0x28] sm:$0xff]  ;;  %v164_v12 = vld [vmem:[#allocation8 + $0x10] sm:$0xff]  ;;  %s273_s8 = sshll.u32 %s548_s7, 4  ;;  %s274_s8 = int_to_ptr.vmem [resolvable:$true] %s273_s8 }
  0x39   :  { %v162_v10 = vld [vmem:[#allocation8] sm:$0xff]  ;;  %v163_v11 = vld [vmem:[#allocation8 + $0x8] sm:$0xff]  ;;  %v165_v13 = vld [vmem:[#allocation8 + $0x18] sm:$0xff]  ;;  %v396_v14 = vpack.c.bf16 %v71_v9, %v70_v8  ;;  %p517_p11 = scmp.lt.s32.totalorder %s274_s8, %s274_s8 }
  0x3a   :  { %391 = vmatpush3.bf16.msra.mxu0 %v390_v5  ;;  %v414_v15 = vpack.c.bf16 %v163_v11, %v162_v10  ;;  %v72_v16 = vld [vmem:[#allocation6 + $0x30] sm:$0xff]  ;;  %v73_v17 = vld [vmem:[#allocation6 + $0x38] sm:$0xff]  ;;  %v417_v18 = vpack.c.bf16 %v165_v13, %v164_v12  ;;  %v166_v19 = vld [vmem:[#allocation8 + $0x20] sm:$0xff] }
  0x3b   :  { %392 = vmatprep.subr.bf16.mxu0 %v545_v0  ;;  %v167_v20 = vld [vmem:[#allocation8 + $0x28] sm:$0xff]  ;;  %v399_v21 = vpack.c.bf16 %v73_v17, %v72_v16  ;;  %v74_v22 = vld [vmem:[#allocation6 + $0x40] sm:$0xff]  ;;  %v168_v25 = vld [vmem:[#allocation8 + $0x30] sm:$0xff] }
  0x3c   :  { %415 = vmatpush3.bf16.msra.mxu1 %v414_v15  ;;  %v75_v23 = vld [vmem:[#allocation6 + $0x48] sm:$0xff]  ;;  %v420_v24 = vpack.c.bf16 %v167_v20, %v166_v19  ;;  %v169_v26 = vld [vmem:[#allocation8 + $0x38] sm:$0xff]  ;;  %v76_v28 = vld [vmem:[#allocation6 + $0x50] sm:$0xff] }
  0x3d   :  { %416 = vmatprep.subr.bf16.mxu1 %v545_v0  ;;  %v402_v27 = vpack.c.bf16 %v75_v23, %v74_v22  ;;  %v77_v29 = vld [vmem:[#allocation6 + $0x58] sm:$0xff]  ;;  %v423_v30 = vpack.c.bf16 %v169_v26, %v168_v25  ;;  %v170_v31 = vld [vmem:[#allocation8 + $0x40] sm:$0xff]  ;;  %v171_v32 = vld [vmem:[#allocation8 + $0x48] sm:$0xff] }
  0x3e   :  { %394 = vmatpush3.bf16.msra.mxu0 %v393_v7  ;;  %v405_v33 = vpack.c.bf16 %v77_v29, %v76_v28  ;;  %v78_v34 = vld [vmem:[#allocation6 + $0x60] sm:$0xff]  ;;  %v79_v35 = vld [vmem:[#allocation6 + $0x68] sm:$0xff]  ;;  %v426_v36 = vpack.c.bf16 %v171_v32, %v170_v31  ;;  %v172_v37 = vld [vmem:[#allocation8 + $0x50] sm:$0xff] }
  0x3f   :  { %395 = vmatprep.subr.bf16.mxu0 %v545_v0  ;;  %v173_v38 = vld [vmem:[#allocation8 + $0x58] sm:$0xff]  ;;  %v408_v39 = vpack.c.bf16 %v79_v35, %v78_v34  ;;  %v80_v40 = vld [vmem:[#allocation6 + $0x70] sm:$0xff]  ;;  %v174_v45 = vld [vmem:[#allocation8 + $0x60] sm:$0xff] }
  0x40   :  { %418 = vmatpush3.bf16.msra.mxu1 %v417_v18  ;;  %v81_v41 = vld [vmem:[#allocation6 + $0x78] sm:$0xff]  ;;  %v429_v42 = vpack.c.bf16 %v173_v38, %v172_v37  ;;  %v175_v46 = vld [vmem:[#allocation8 + $0x68] sm:$0xff]  ;;  %v176_v48 = vld [vmem:[#allocation8 + $0x70] sm:$0xff] }
  0x41   :  { %419 = vmatprep.subr.bf16.mxu1 %v545_v0  ;;  %v411_v43 = vpack.c.bf16 %v81_v41, %v80_v40  ;;  %v65_v44 = vld [vmem:[#allocation3] sm:$0xff]  ;;  %v432_v47 = vpack.c.bf16 %v175_v46, %v174_v45 }
  0x42   :  { %397 = vmatpush3.bf16.msra.mxu0 %v396_v14  ;;  %v177_v49 = vld [vmem:[#allocation8 + $0x78] sm:$0xff] }
  0x43   :  { %398 = vmatprep.subr.bf16.mxu0 %v545_v0  ;;  %v435_v50 = vpack.c.bf16 %v177_v49, %v176_v48  ;;  %v283_v51 = vld [vmem:[%s657_s2] ss:$0 sm:$0xff]  ;;  %s512_s2 = scalar_lea.vmem %s274_s8, 128 }
  0x44   :  { %421 = vmatpush3.bf16.msra.mxu1 %v420_v24  ;;  %v284_v57 = vld [vmem:[%s659_s4] ss:$0 sm:$0xff]  ;;  %p513_p10 = scmp.ne.s32.totalorder %s274_s8, %s512_s2  ;;  %p518_p12 = scmp.lt.s32.totalorder %s512_s2, %s512_s2 }
  0x45   :  { %422 = vmatprep.subr.bf16.mxu1 %v545_v0 }
  0x46   :  { %400 = vmatpush3.bf16.msra.mxu0 %v399_v21  ;;  %p519_p13 = por %p518_p12, %p517_p11 }
  0x47   :  { %401 = vmatprep.subr.bf16.mxu0 %v545_v0 }
  0x48   :  { %424 = vmatpush3.bf16.msra.mxu1 %v423_v30  ;;  %p520_p0 = pnand %p519_p13, %p513_p10 }
  0x49   :  { %425 = vmatprep.subr.bf16.mxu1 %v545_v0 }
  0x4a   :  { %403 = vmatpush3.bf16.msra.mxu0 %v402_v27 }
  0x4b   :  { %404 = vmatprep.subr.bf16.mxu0 %v545_v0 }
  0x4c   :  { %427 = vmatpush3.bf16.msra.mxu1 %v426_v36 }
  0x4d   :  { %428 = vmatprep.subr.bf16.mxu1 %v545_v0 }
  0x4e   :  { %406 = vmatpush3.bf16.msra.mxu0 %v405_v33 }
  0x4f   :  { %407 = vmatprep.subr.bf16.mxu0 %v545_v0 }
  0x50   :  { %430 = vmatpush3.bf16.msra.mxu1 %v429_v42 }
  0x51   :  { %431 = vmatprep.subr.bf16.mxu1 %v545_v0 }
  0x52   :  { %409 = vmatpush3.bf16.msra.mxu0 %v408_v39 }
  0x53   :  { %410 = vmatprep.subr.bf16.mxu0 %v545_v0 }
  0x54   :  { %433 = vmatpush3.bf16.msra.mxu1 %v432_v47 }
  0x55   :  { %434 = vmatprep.subr.bf16.mxu1 %v545_v0 }
  0x56   :  { %412 = vmatpush3.bf16.msra.mxu0 %v411_v43 }
  0x58   :  { %436 = vmatpush3.bf16.msra.mxu1 %v435_v50 }
  0x59   :  { %352 = vmatmul.mubr.f32.vlgmr.msra.gmra.mrb[0].mxu0 %v65_v44 }
 0x12c   :  { %v155_v52 = vpop.f32.mrb[0].mxu0 }
 0x12d   :  { %v156_v53 = vadd.f32 %v283_v51, %v155_v52  ;;  %v353_v54 = vpop.f32.mrb[1].mxu0 }
 0x12f   :  { %v159_v55 = vmul.f32 0.2, %v156_v53 }
 0x131   :  { %v160_v56 = vmax.f32 %v156_v53, %v159_v55 }
 0x133   :  { %387 = vmatmul.mubr.f32.vlgmr.msra.gmra.mrb[0].mxu1 %v160_v56 }
 0x206   :  { %v244_v58 = vpop.f32.mrb[0].mxu1 }
 0x207   :  { %v261_v59 = vadd.f32 %v284_v57, %v244_v58  ;;  %v388_v60 = vpop.f32.mrb[1].mxu1 }
 0x209   :  { %v263_v61 = vadd.f32 %v261_v59, %v65_v44 }
 0x20b   :  { %v264_v62 = vmul.f32 0.2, %v263_v61 }
 0x20d   :  { %v265_v63 = vmax.f32 %v263_v61, %v264_v62 }
 0x20f   :  { %266 = vst [vmem:[#allocation9] sm:$0xff] %v265_v63 }
 0x210   :  { %523 = shalt.err (!%p520_p0)
}
 0x211   :  { %s524_s4 = scalar_lea.hbm %s660_s5, 128 }
 0x212   :  { %p525_p1 = scmp.ne.s32.totalorder %s660_s5, %s524_s4  ;;  %p528_p2 = scmp.lt.u32.totalorder %s524_s4, %s660_s5 }
 0x214   :  { %p530_p3 = pnand %p528_p2, %p525_p1 }
 0x216   :  { %533 = shalt.err (!%p530_p3)
}
 0x217   :  { %276 = dma.vmem_to_hbm [thread:$0]  %s274_s8, 128, %s660_s5, [#allocation5]  }
 0x218   :  { %538 = dma.done.wait [#allocation5], 128  }
 0x219   :  { %539 = vsyncadd [#allocation5], 4294967168 }
 0x21a   :  { %280 = vsyncpa [#allocation4], 1 }
 0x21b   :  { %281 = vsyncpa [#allocation7], 1 }
 0x21c   :  { %282 = vsyncpa [#allocation5], 1 }

</bundles_post_ra>
